<compile_context>
chip_gen: v7x
topology: tpu7x:2x2x1
jax: 0.10.0
libtpu: 0.0.40
codegen_flags: <defaults>
</compile_context>

<pallas_src>
import functools

import jax
import jax.numpy as jnp
from jax import lax
from jax.experimental import pallas as pl
from jax.experimental.pallas import tpu as pltpu


# ----------------------------------------------------------------------------
# Fused EMHA kernel: one (batch, split) chunk per grid step, channels-first.
#   x_ref     : (1, C, nc)  f32   activation slab (channels x chunk)
#   wqkvT_ref : (3Cr, C)    bf16  fused (toQKV o reduction) weight, scale folded into Q rows
#   bqkv_ref  : (3Cr, 1)    f32   fused bias
#   wexpT_ref : (C, Cr)     bf16  expansion conv weight
#   bexp_ref  : (C, 1)      f32   expansion bias
#   o_ref     : (1, C, nc)  f32   output slab
#   oh_ref    : (Cr, nc)    bf16  VMEM scratch holding all heads' attention output
# ----------------------------------------------------------------------------
def _emha_kernel(x_ref, wqkvT_ref, bqkv_ref, wexpT_ref, bexp_ref, o_ref, oh_ref,
                 *, heads, dim_head, c_red):
    Cr, d = c_red, dim_head

    xT = x_ref[0].astype(jnp.bfloat16)                                    # (C, nc)

    # Fused reduction-conv + toQKV projection (softmax scale pre-folded into Q rows).
    qkvT = jnp.dot(wqkvT_ref[...], xT,
                   preferred_element_type=jnp.float32)                    # (3Cr, nc) f32
    qkvT = qkvT + bqkv_ref[...]                                           # lane-broadcast bias

    # heads is small & static -> fully unrolled; head slices are sublane slices.
    for h in range(heads):
        qT = qkvT[h * d:(h + 1) * d, :].astype(jnp.bfloat16)              # (d, nc)
        kT = qkvT[Cr + h * d:Cr + (h + 1) * d, :].astype(jnp.bfloat16)    # (d, nc)
        vT = qkvT[2 * Cr + h * d:2 * Cr + (h + 1) * d, :].astype(jnp.bfloat16)

        # scores[q, k] = sum_d (scale*q)[d, q] * k[d, k]     ("T-N" 2-D matmul)
        s = lax.dot_general(qT, kT, (((0,), (0,)), ((), ())),
                            preferred_element_type=jnp.float32)           # (nc, nc) f32
        s = s - jnp.max(s, axis=-1, keepdims=True)
        p = jnp.exp(s)
        p = p * pl.reciprocal(jnp.sum(p, axis=-1, keepdims=True), approx=True)

        # oh[d, q] = sum_k v[d, k] * p[q, k]                 ("N-T" 2-D matmul)
        ohT = lax.dot_general(vT, p.astype(jnp.bfloat16),
                              (((1,), (1,)), ((), ())),
                              preferred_element_type=jnp.float32)         # (d, nc)
        oh_ref[h * d:(h + 1) * d, :] = ohT.astype(jnp.bfloat16)           # static sublane offset

    # Single Cr-deep expansion matmul for all heads: (C, Cr) @ (Cr, nc) -> (C, nc)
    outT = jnp.dot(wexpT_ref[...], oh_ref[...],
                   preferred_element_type=jnp.float32)
    o_ref[0] = (outT + bexp_ref[...]).astype(o_ref.dtype)


# ----------------------------------------------------------------------------
# Parameter prep: fuse reduction+toQKV algebraically (in f32), fold the softmax
# scale into the Q rows, then cast MXU weights to bf16 once.
# ----------------------------------------------------------------------------
def prepare_emha_params(params, heads):
    w_red, b_red = params['w_red'], params['b_red']      # (Cr, C), (Cr,)
    w_qkv = params['w_qkv']                              # (3Cr, Cr)
    w_exp, b_exp = params['w_exp'], params['b_exp']      # (C, Cr), (C,)
    Cr, C = w_red.shape
    d = Cr // heads
    scale = float(d) ** (-0.5)

    # qkvT = W_f^T @ x_cols + b_f ; W_f^T = w_qkv @ w_red , b_f = w_qkv @ b_red
    w_fT = (w_qkv @ w_red).astype(jnp.float32)           # (3Cr, C)
    b_f = (w_qkv @ b_red).astype(jnp.float32)            # (3Cr,)
    scale_vec = jnp.concatenate([jnp.full((Cr,), scale, jnp.float32),
                                 jnp.ones((2 * Cr,), jnp.float32)])
    w_fT = w_fT * scale_vec[:, None]                     # fold scale into Q rows (f32), ...
    b_f = b_f * scale_vec

    return {
        'w_qkvT': w_fT.astype(jnp.bfloat16),             # ... then cast to bf16 for the MXU
        'b_qkv': b_f.reshape(3 * Cr, 1),                 # f32 bias (added post-accumulation)
        'w_expT': w_exp.astype(jnp.bfloat16),            # (C, Cr)
        'b_exp': b_exp.reshape(C, 1).astype(jnp.float32),
    }


# ----------------------------------------------------------------------------
# EMHA forward
# ----------------------------------------------------------------------------
def emha_forward(x, prep, heads=8, split_factors=4):
    B, C, N = x.shape
    Cr = C // 2
    assert N % split_factors == 0, "sequence length must divide splitFactors"
    assert Cr % heads == 0, "inChannels must be divisible by 2*heads"
    nc = N // split_factors
    d = Cr // heads

    kernel = functools.partial(_emha_kernel, heads=heads, dim_head=d, c_red=Cr)

    # Direct path: read/write the module's native (B, C, N) layout when the chunk
    # length is lane-aligned (nc % 128 == 0) -> no wrapper transposes, lane-dense
    # output stores.  Otherwise (tiny/odd nc) fall back to a cheap blocked
    # transpose so every BlockSpec keeps full-extent last-two dims (always legal).
    direct = (nc % 128 == 0)
    if direct:
        x_in = x
        x_spec = pl.BlockSpec((1, C, nc), lambda b, s: (b, 0, s))
        o_spec = pl.BlockSpec((1, C, nc), lambda b, s: (b, 0, s))
        out_shape = jax.ShapeDtypeStruct((B, C, N), x.dtype)
    else:
        x_in = (x.reshape(B, C, split_factors, nc)
                 .transpose(0, 2, 1, 3)
                 .reshape(B * split_factors, C, nc))
        x_spec = pl.BlockSpec((1, C, nc), lambda b, s: (b * split_factors + s, 0, 0))
        o_spec = pl.BlockSpec((1, C, nc), lambda b, s: (b * split_factors + s, 0, 0))
        out_shape = jax.ShapeDtypeStruct((B * split_factors, C, nc), x.dtype)

    out = pl.pallas_call(
        kernel,
        out_shape=out_shape,
        grid=(B, split_factors),
        in_specs=[
            x_spec,
            pl.BlockSpec((3 * Cr, C), lambda b, s: (0, 0)),   # weights stay VMEM-resident
            pl.BlockSpec((3 * Cr, 1), lambda b, s: (0, 0)),
            pl.BlockSpec((C, Cr), lambda b, s: (0, 0)),
            pl.BlockSpec((C, 1), lambda b, s: (0, 0)),
        ],
        out_specs=o_spec,
        scratch_shapes=[pltpu.VMEM((Cr, nc), jnp.bfloat16)],
        compiler_params=pltpu.CompilerParams(
            dimension_semantics=("parallel", "parallel"),
            vmem_limit_bytes=48 * 1024 * 1024),               # > 32MiB default, < v7x 64MiB physical
    )(x_in, prep['w_qkvT'], prep['b_qkv'], prep['w_expT'], prep['b_exp'])

    if direct:
        return out
    return (out.reshape(B, split_factors, C, nc)
               .transpose(0, 2, 1, 3)
               .reshape(B, C, N))


# ----------------------------------------------------------------------------
# Pure-JAX f32 reference (mirrors the PyTorch forward) for validation
# ----------------------------------------------------------------------------
def emha_reference(x, params, heads=8, split_factors=4):
    B, C, N = x.shape
    Cr = C // 2
    d = Cr // heads
    scale = float(d) ** (-0.5)
    nc = N // split_factors

    xr = jnp.einsum('bcn,oc->bon', x, params['w_red']) + params['b_red'][None, :, None]
    xr = jnp.transpose(xr, (0, 2, 1))                      # (B, N, Cr)
    qkv = xr @ params['w_qkv'].T                           # (B, N, 3Cr)
    q, k, v = jnp.split(qkv, 3, axis=-1)

    def rearr(t):
        return jnp.transpose(t.reshape(B, N, heads, d), (0, 2, 1, 3))

    q, k, v = map(rearr, (q, k, v))
    outs = []
    for s in range(split_factors):
        sl = slice(s * nc, (s + 1) * nc)
        qi, ki, vi = q[:, :, sl], k[:, :, sl], v[:, :, sl]
        attn = jax.nn.softmax(jnp.einsum('bhqd,bhkd->bhqk', qi, ki) * scale, axis=-1)
        o = jnp.einsum('bhqk,bhkd->bhqd', attn, vi)
        outs.append(jnp.transpose(o, (0, 2, 1, 3)).reshape(B, nc, Cr))
    out = jnp.concatenate(outs, axis=1)                    # (B, N, Cr)
    out = jnp.transpose(out, (0, 2, 1))                    # (B, Cr, N)
    out = jnp.einsum('bcn,oc->bon', out, params['w_exp']) + params['b_exp'][None, :, None]
    return out


# ----------------------------------------------------------------------------
# Deterministic parameter init (shapes match the PyTorch module's __init__)
# ----------------------------------------------------------------------------
def init_params(key, in_channels):
    Cr = in_channels // 2
    k1, k2, k3, k4, k5 = jax.random.split(key, 5)
    return {
        # Conv1d(C, C/2, 1): weight (C/2, C, 1) -> kernel dim squeezed
        'w_red': 0.1 * jax.random.normal(k1, (Cr, in_channels), jnp.float32),
        'b_red': 0.1 * jax.random.normal(k2, (Cr,), jnp.float32),
        # Linear(C/2, 3*C/2, bias=False): weight (3*C/2, C/2)
        'w_qkv': 0.1 * jax.random.normal(k3, (3 * Cr, Cr), jnp.float32),
        # Conv1d(C/2, C, 1): weight (C, C/2, 1) -> kernel dim squeezed
        'w_exp': 0.1 * jax.random.normal(k4, (in_channels, Cr), jnp.float32),
        'b_exp': 0.1 * jax.random.normal(k5, (in_channels,), jnp.float32),
    }


def _run_case(B, C, N, heads, split_factors, key):
    kx, kp = jax.random.split(key)
    x = jax.random.normal(kx, (B, C, N), jnp.float32)
    params = init_params(kp, C)
    prep = prepare_emha_params(params, heads)

    fwd = jax.jit(functools.partial(emha_forward, heads=heads,
                                    split_factors=split_factors))
    out = jax.block_until_ready(fwd(x, prep))

    ref = emha_reference(x, params, heads=heads, split_factors=split_factors)
    assert out.shape == (B, C, N), out.shape
    max_diff = float(jnp.max(jnp.abs(out - ref)))
    # bf16 MXU operands (f32 accumulation) -> looser tolerance than a pure-f32 path.
    assert jnp.allclose(out, ref, atol=3e-2, rtol=3e-2), f"max abs diff {max_diff}"
    return max_diff


if __name__ == "__main__":
    heads, split_factors = 8, 4
    key = jax.random.PRNGKey(0)
    k1, k2 = jax.random.split(key)

    # Small shape (nc = 4): exercises the blocked-transpose fallback path.
    _run_case(B=2, C=64, N=16, heads=heads, split_factors=split_factors, key=k1)
    # Lane-aligned shape (nc = 128): exercises the direct (B, C, N) in-place path.
    _run_case(B=2, C=64, N=512, heads=heads, split_factors=split_factors, key=k2)

    print("KERNEL_OK")
</pallas_src>

<mosaic_0001>
module attributes {stable_mosaic.version = 11 : i64} {
  func.func @_emha_kernel(%arg0: i32, %arg1: i32, %arg2: memref<1x64x4xf32, #tpu.memory_space<vmem>>, %arg3: memref<96x64xbf16, #tpu.memory_space<vmem>>, %arg4: memref<96x1xf32, #tpu.memory_space<vmem>>, %arg5: memref<64x32xbf16, #tpu.memory_space<vmem>>, %arg6: memref<64x1xf32, #tpu.memory_space<vmem>>, %arg7: memref<1x64x4xf32, #tpu.memory_space<vmem>>, %arg8: memref<32x4xbf16, #tpu.memory_space<vmem>>) attributes {dimension_semantics = [#tpu.dimension_semantics<parallel>, #tpu.dimension_semantics<parallel>], iteration_bounds = array<i64: 2, 4>, scalar_prefetch = 0 : i64, scratch_operands = 1 : i64, tpu.core_type = #tpu.core_type<tc>, window_params = [{transform_indices = @transform_0, window_bounds = array<i64: 1, 64, 4>}, {pipeline_mode = #tpu.pipeline_mode<synchronous>, transform_indices = @transform_1, window_bounds = array<i64: 96, 64>}, {pipeline_mode = #tpu.pipeline_mode<synchronous>, transform_indices = @transform_2, window_bounds = array<i64: 96, 1>}, {pipeline_mode = #tpu.pipeline_mode<synchronous>, transform_indices = @transform_3, window_bounds = array<i64: 64, 32>}, {pipeline_mode = #tpu.pipeline_mode<synchronous>, transform_indices = @transform_4, window_bounds = array<i64: 64, 1>}, {transform_indices = @transform_5, window_bounds = array<i64: 1, 64, 4>}]} {
    %c0 = arith.constant 0 : index
    %c0_0 = arith.constant 0 : index
    %c0_1 = arith.constant 0 : index
    %0 = vector.load %arg2[%c0, %c0_0, %c0_1] : memref<1x64x4xf32, #tpu.memory_space<vmem>>, vector<1x64x4xf32>
    %1 = vector.shape_cast %0 : vector<1x64x4xf32> to vector<64x4xf32>
    %2 = arith.truncf %1 : vector<64x4xf32> to vector<64x4xbf16>
    %c0_2 = arith.constant 0 : index
    %c0_3 = arith.constant 0 : index
    %3 = vector.load %arg3[%c0_2, %c0_3] : memref<96x64xbf16, #tpu.memory_space<vmem>>, vector<96x64xbf16>
    %cst = arith.constant dense<0.000000e+00> : vector<96x4xf32>
    %4 = tpu.matmul %3, %2, %cst {dimension_numbers = #tpu.dot_dimension_numbers<[1], [0], [0], [1], [0, 0, 1, 1], [], []>} : vector<96x64xbf16>, vector<64x4xbf16>, vector<96x4xf32> -> vector<96x4xf32>
    %c0_4 = arith.constant 0 : index
    %c0_5 = arith.constant 0 : index
    %5 = vector.load %arg4[%c0_4, %c0_5] : memref<96x1xf32, #tpu.memory_space<vmem>>, vector<96x1xf32>
    %6 = vector.broadcast %5 : vector<96x1xf32> to vector<96x4xf32>
    %7 = arith.addf %4, %6 : vector<96x4xf32>
    %8 = vector.extract_strided_slice %7 {offsets = [0, 0], sizes = [4, 4], strides = [1, 1]} : vector<96x4xf32> to vector<4x4xf32>
    %9 = arith.truncf %8 : vector<4x4xf32> to vector<4x4xbf16>
    %10 = vector.extract_strided_slice %7 {offsets = [32, 0], sizes = [4, 4], strides = [1, 1]} : vector<96x4xf32> to vector<4x4xf32>
    %11 = arith.truncf %10 : vector<4x4xf32> to vector<4x4xbf16>
    %12 = vector.extract_strided_slice %7 {offsets = [64, 0], sizes = [4, 4], strides = [1, 1]} : vector<96x4xf32> to vector<4x4xf32>
    %13 = arith.truncf %12 : vector<4x4xf32> to vector<4x4xbf16>
    %cst_6 = arith.constant dense<0.000000e+00> : vector<4x4xf32>
    %14 = tpu.matmul %9, %11, %cst_6 {dimension_numbers = #tpu.dot_dimension_numbers<[0], [0], [1], [1], [0, 1, 1, 1], [], []>} : vector<4x4xbf16>, vector<4x4xbf16>, vector<4x4xf32> -> vector<4x4xf32>
    %cst_7 = arith.constant dense<0xFF800000> : vector<4xf32>
    %15 = vector.multi_reduction <maximumf>, %14, %cst_7 [1] : vector<4x4xf32> to vector<4xf32>
    %16 = vector.shape_cast %15 : vector<4xf32> to vector<4x1xf32>
    %17 = vector.broadcast %16 : vector<4x1xf32> to vector<4x4xf32>
    %18 = arith.subf %14, %17 : vector<4x4xf32>
    %19 = math.exp %18 : vector<4x4xf32>
    %cst_8 = arith.constant dense<0.000000e+00> : vector<4xf32>
    %20 = vector.multi_reduction <add>, %19, %cst_8 [1] : vector<4x4xf32> to vector<4xf32>
    %21 = vector.shape_cast %20 : vector<4xf32> to vector<4x1xf32>
    %22 = tpu.reciprocal %21 {approx = true} : vector<4x1xf32> -> vector<4x1xf32>
    %23 = vector.broadcast %22 : vector<4x1xf32> to vector<4x4xf32>
    %24 = arith.mulf %19, %23 : vector<4x4xf32>
    %25 = arith.truncf %24 : vector<4x4xf32> to vector<4x4xbf16>
    %cst_9 = arith.constant dense<0.000000e+00> : vector<4x4xf32>
    %26 = tpu.matmul %13, %25, %cst_9 {dimension_numbers = #tpu.dot_dimension_numbers<[1], [1], [0], [0], [0, 0, 1, 0], [], []>} : vector<4x4xbf16>, vector<4x4xbf16>, vector<4x4xf32> -> vector<4x4xf32>
    %27 = arith.truncf %26 : vector<4x4xf32> to vector<4x4xbf16>
    %c0_10 = arith.constant 0 : index
    %c0_11 = arith.constant 0 : index
    %28 = vector.load %arg8[%c0_10, %c0_11] : memref<32x4xbf16, #tpu.memory_space<vmem>>, vector<4x4xbf16>
    tpu.vector_store %arg8[%c0_10, %c0_11], %27 {strides = array<i32>} : memref<32x4xbf16, #tpu.memory_space<vmem>>, vector<4x4xbf16>,
    %29 = vector.extract_strided_slice %7 {offsets = [4, 0], sizes = [4, 4], strides = [1, 1]} : vector<96x4xf32> to vector<4x4xf32>
    %30 = arith.truncf %29 : vector<4x4xf32> to vector<4x4xbf16>
    %31 = vector.extract_strided_slice %7 {offsets = [36, 0], sizes = [4, 4], strides = [1, 1]} : vector<96x4xf32> to vector<4x4xf32>
    %32 = arith.truncf %31 : vector<4x4xf32> to vector<4x4xbf16>
    %33 = vector.extract_strided_slice %7 {offsets = [68, 0], sizes = [4, 4], strides = [1, 1]} : vector<96x4xf32> to vector<4x4xf32>
    %34 = arith.truncf %33 : vector<4x4xf32> to vector<4x4xbf16>
    %cst_12 = arith.constant dense<0.000000e+00> : vector<4x4xf32>
    %35 = tpu.matmul %30, %32, %cst_12 {dimension_numbers = #tpu.dot_dimension_numbers<[0], [0], [1], [1], [0, 1, 1, 1], [], []>} : vector<4x4xbf16>, vector<4x4xbf16>, vector<4x4xf32> -> vector<4x4xf32>
    %cst_13 = arith.constant dense<0xFF800000> : vector<4xf32>
    %36 = vector.multi_reduction <maximumf>, %35, %cst_13 [1] : vector<4x4xf32> to vector<4xf32>
    %37 = vector.shape_cast %36 : vector<4xf32> to vector<4x1xf32>
    %38 = vector.broadcast %37 : vector<4x1xf32> to vector<4x4xf32>
    %39 = arith.subf %35, %38 : vector<4x4xf32>
    %40 = math.exp %39 : vector<4x4xf32>
    %cst_14 = arith.constant dense<0.000000e+00> : vector<4xf32>
    %41 = vector.multi_reduction <add>, %40, %cst_14 [1] : vector<4x4xf32> to vector<4xf32>
    %42 = vector.shape_cast %41 : vector<4xf32> to vector<4x1xf32>
    %43 = tpu.reciprocal %42 {approx = true} : vector<4x1xf32> -> vector<4x1xf32>
    %44 = vector.broadcast %43 : vector<4x1xf32> to vector<4x4xf32>
    %45 = arith.mulf %40, %44 : vector<4x4xf32>
    %46 = arith.truncf %45 : vector<4x4xf32> to vector<4x4xbf16>
    %cst_15 = arith.constant dense<0.000000e+00> : vector<4x4xf32>
    %47 = tpu.matmul %34, %46, %cst_15 {dimension_numbers = #tpu.dot_dimension_numbers<[1], [1], [0], [0], [0, 0, 1, 0], [], []>} : vector<4x4xbf16>, vector<4x4xbf16>, vector<4x4xf32> -> vector<4x4xf32>
    %48 = arith.truncf %47 : vector<4x4xf32> to vector<4x4xbf16>
    %c4 = arith.constant 4 : index
    %c0_16 = arith.constant 0 : index
    %49 = vector.load %arg8[%c4, %c0_16] : memref<32x4xbf16, #tpu.memory_space<vmem>>, vector<4x4xbf16>
    tpu.vector_store %arg8[%c4, %c0_16], %48 {strides = array<i32>} : memref<32x4xbf16, #tpu.memory_space<vmem>>, vector<4x4xbf16>,
    %50 = vector.extract_strided_slice %7 {offsets = [8, 0], sizes = [4, 4], strides = [1, 1]} : vector<96x4xf32> to vector<4x4xf32>
    %51 = arith.truncf %50 : vector<4x4xf32> to vector<4x4xbf16>
    %52 = vector.extract_strided_slice %7 {offsets = [40, 0], sizes = [4, 4], strides = [1, 1]} : vector<96x4xf32> to vector<4x4xf32>
    %53 = arith.truncf %52 : vector<4x4xf32> to vector<4x4xbf16>
    %54 = vector.extract_strided_slice %7 {offsets = [72, 0], sizes = [4, 4], strides = [1, 1]} : vector<96x4xf32> to vector<4x4xf32>
    %55 = arith.truncf %54 : vector<4x4xf32> to vector<4x4xbf16>
    %cst_17 = arith.constant dense<0.000000e+00> : vector<4x4xf32>
    %56 = tpu.matmul %51, %53, %cst_17 {dimension_numbers = #tpu.dot_dimension_numbers<[0], [0], [1], [1], [0, 1, 1, 1], [], []>} : vector<4x4xbf16>, vector<4x4xbf16>, vector<4x4xf32> -> vector<4x4xf32>
    %cst_18 = arith.constant dense<0xFF800000> : vector<4xf32>
    %57 = vector.multi_reduction <maximumf>, %56, %cst_18 [1] : vector<4x4xf32> to vector<4xf32>
    %58 = vector.shape_cast %57 : vector<4xf32> to vector<4x1xf32>
    %59 = vector.broadcast %58 : vector<4x1xf32> to vector<4x4xf32>
    %60 = arith.subf %56, %59 : vector<4x4xf32>
    %61 = math.exp %60 : vector<4x4xf32>
    %cst_19 = arith.constant dense<0.000000e+00> : vector<4xf32>
    %62 = vector.multi_reduction <add>, %61, %cst_19 [1] : vector<4x4xf32> to vector<4xf32>
    %63 = vector.shape_cast %62 : vector<4xf32> to vector<4x1xf32>
    %64 = tpu.reciprocal %63 {approx = true} : vector<4x1xf32> -> vector<4x1xf32>
    %65 = vector.broadcast %64 : vector<4x1xf32> to vector<4x4xf32>
    %66 = arith.mulf %61, %65 : vector<4x4xf32>
    %67 = arith.truncf %66 : vector<4x4xf32> to vector<4x4xbf16>
    %cst_20 = arith.constant dense<0.000000e+00> : vector<4x4xf32>
    %68 = tpu.matmul %55, %67, %cst_20 {dimension_numbers = #tpu.dot_dimension_numbers<[1], [1], [0], [0], [0, 0, 1, 0], [], []>} : vector<4x4xbf16>, vector<4x4xbf16>, vector<4x4xf32> -> vector<4x4xf32>
    %69 = arith.truncf %68 : vector<4x4xf32> to vector<4x4xbf16>
    %c8 = arith.constant 8 : index
    %c0_21 = arith.constant 0 : index
    %70 = vector.load %arg8[%c8, %c0_21] : memref<32x4xbf16, #tpu.memory_space<vmem>>, vector<4x4xbf16>
    tpu.vector_store %arg8[%c8, %c0_21], %69 {strides = array<i32>} : memref<32x4xbf16, #tpu.memory_space<vmem>>, vector<4x4xbf16>,
    %71 = vector.extract_strided_slice %7 {offsets = [12, 0], sizes = [4, 4], strides = [1, 1]} : vector<96x4xf32> to vector<4x4xf32>
    %72 = arith.truncf %71 : vector<4x4xf32> to vector<4x4xbf16>
    %73 = vector.extract_strided_slice %7 {offsets = [44, 0], sizes = [4, 4], strides = [1, 1]} : vector<96x4xf32> to vector<4x4xf32>
    %74 = arith.truncf %73 : vector<4x4xf32> to vector<4x4xbf16>
    %75 = vector.extract_strided_slice %7 {offsets = [76, 0], sizes = [4, 4], strides = [1, 1]} : vector<96x4xf32> to vector<4x4xf32>
    %76 = arith.truncf %75 : vector<4x4xf32> to vector<4x4xbf16>
    %cst_22 = arith.constant dense<0.000000e+00> : vector<4x4xf32>
    %77 = tpu.matmul %72, %74, %cst_22 {dimension_numbers = #tpu.dot_dimension_numbers<[0], [0], [1], [1], [0, 1, 1, 1], [], []>} : vector<4x4xbf16>, vector<4x4xbf16>, vector<4x4xf32> -> vector<4x4xf32>
    %cst_23 = arith.constant dense<0xFF800000> : vector<4xf32>
    %78 = vector.multi_reduction <maximumf>, %77, %cst_23 [1] : vector<4x4xf32> to vector<4xf32>
    %79 = vector.shape_cast %78 : vector<4xf32> to vector<4x1xf32>
    %80 = vector.broadcast %79 : vector<4x1xf32> to vector<4x4xf32>
    %81 = arith.subf %77, %80 : vector<4x4xf32>
    %82 = math.exp %81 : vector<4x4xf32>
    %cst_24 = arith.constant dense<0.000000e+00> : vector<4xf32>
    %83 = vector.multi_reduction <add>, %82, %cst_24 [1] : vector<4x4xf32> to vector<4xf32>
    %84 = vector.shape_cast %83 : vector<4xf32> to vector<4x1xf32>
    %85 = tpu.reciprocal %84 {approx = true} : vector<4x1xf32> -> vector<4x1xf32>
    %86 = vector.broadcast %85 : vector<4x1xf32> to vector<4x4xf32>
    %87 = arith.mulf %82, %86 : vector<4x4xf32>
    %88 = arith.truncf %87 : vector<4x4xf32> to vector<4x4xbf16>
    %cst_25 = arith.constant dense<0.000000e+00> : vector<4x4xf32>
    %89 = tpu.matmul %76, %88, %cst_25 {dimension_numbers = #tpu.dot_dimension_numbers<[1], [1], [0], [0], [0, 0, 1, 0], [], []>} : vector<4x4xbf16>, vector<4x4xbf16>, vector<4x4xf32> -> vector<4x4xf32>
    %90 = arith.truncf %89 : vector<4x4xf32> to vector<4x4xbf16>
    %c12 = arith.constant 12 : index
    %c0_26 = arith.constant 0 : index
    %91 = vector.load %arg8[%c12, %c0_26] : memref<32x4xbf16, #tpu.memory_space<vmem>>, vector<4x4xbf16>
    tpu.vector_store %arg8[%c12, %c0_26], %90 {strides = array<i32>} : memref<32x4xbf16, #tpu.memory_space<vmem>>, vector<4x4xbf16>,
    %92 = vector.extract_strided_slice %7 {offsets = [16, 0], sizes = [4, 4], strides = [1, 1]} : vector<96x4xf32> to vector<4x4xf32>
    %93 = arith.truncf %92 : vector<4x4xf32> to vector<4x4xbf16>
    %94 = vector.extract_strided_slice %7 {offsets = [48, 0], sizes = [4, 4], strides = [1, 1]} : vector<96x4xf32> to vector<4x4xf32>
    %95 = arith.truncf %94 : vector<4x4xf32> to vector<4x4xbf16>
    %96 = vector.extract_strided_slice %7 {offsets = [80, 0], sizes = [4, 4], strides = [1, 1]} : vector<96x4xf32> to vector<4x4xf32>
    %97 = arith.truncf %96 : vector<4x4xf32> to vector<4x4xbf16>
    %cst_27 = arith.constant dense<0.000000e+00> : vector<4x4xf32>
    %98 = tpu.matmul %93, %95, %cst_27 {dimension_numbers = #tpu.dot_dimension_numbers<[0], [0], [1], [1], [0, 1, 1, 1], [], []>} : vector<4x4xbf16>, vector<4x4xbf16>, vector<4x4xf32> -> vector<4x4xf32>
    %cst_28 = arith.constant dense<0xFF800000> : vector<4xf32>
    %99 = vector.multi_reduction <maximumf>, %98, %cst_28 [1] : vector<4x4xf32> to vector<4xf32>
    %100 = vector.shape_cast %99 : vector<4xf32> to vector<4x1xf32>
    %101 = vector.broadcast %100 : vector<4x1xf32> to vector<4x4xf32>
    %102 = arith.subf %98, %101 : vector<4x4xf32>
    %103 = math.exp %102 : vector<4x4xf32>
    %cst_29 = arith.constant dense<0.000000e+00> : vector<4xf32>
    %104 = vector.multi_reduction <add>, %103, %cst_29 [1] : vector<4x4xf32> to vector<4xf32>
    %105 = vector.shape_cast %104 : vector<4xf32> to vector<4x1xf32>
    %106 = tpu.reciprocal %105 {approx = true} : vector<4x1xf32> -> vector<4x1xf32>
    %107 = vector.broadcast %106 : vector<4x1xf32> to vector<4x4xf32>
    %108 = arith.mulf %103, %107 : vector<4x4xf32>
    %109 = arith.truncf %108 : vector<4x4xf32> to vector<4x4xbf16>
    %cst_30 = arith.constant dense<0.000000e+00> : vector<4x4xf32>
    %110 = tpu.matmul %97, %109, %cst_30 {dimension_numbers = #tpu.dot_dimension_numbers<[1], [1], [0], [0], [0, 0, 1, 0], [], []>} : vector<4x4xbf16>, vector<4x4xbf16>, vector<4x4xf32> -> vector<4x4xf32>
    %111 = arith.truncf %110 : vector<4x4xf32> to vector<4x4xbf16>
    %c16 = arith.constant 16 : index
    %c0_31 = arith.constant 0 : index
    %112 = vector.load %arg8[%c16, %c0_31] : memref<32x4xbf16, #tpu.memory_space<vmem>>, vector<4x4xbf16>
    tpu.vector_store %arg8[%c16, %c0_31], %111 {strides = array<i32>} : memref<32x4xbf16, #tpu.memory_space<vmem>>, vector<4x4xbf16>,
    %113 = vector.extract_strided_slice %7 {offsets = [20, 0], sizes = [4, 4], strides = [1, 1]} : vector<96x4xf32> to vector<4x4xf32>
    %114 = arith.truncf %113 : vector<4x4xf32> to vector<4x4xbf16>
    %115 = vector.extract_strided_slice %7 {offsets = [52, 0], sizes = [4, 4], strides = [1, 1]} : vector<96x4xf32> to vector<4x4xf32>
    %116 = arith.truncf %115 : vector<4x4xf32> to vector<4x4xbf16>
    %117 = vector.extract_strided_slice %7 {offsets = [84, 0], sizes = [4, 4], strides = [1, 1]} : vector<96x4xf32> to vector<4x4xf32>
    %118 = arith.truncf %117 : vector<4x4xf32> to vector<4x4xbf16>
    %cst_32 = arith.constant dense<0.000000e+00> : vector<4x4xf32>
    %119 = tpu.matmul %114, %116, %cst_32 {dimension_numbers = #tpu.dot_dimension_numbers<[0], [0], [1], [1], [0, 1, 1, 1], [], []>} : vector<4x4xbf16>, vector<4x4xbf16>, vector<4x4xf32> -> vector<4x4xf32>
    %cst_33 = arith.constant dense<0xFF800000> : vector<4xf32>
    %120 = vector.multi_reduction <maximumf>, %119, %cst_33 [1] : vector<4x4xf32> to vector<4xf32>
    %121 = vector.shape_cast %120 : vector<4xf32> to vector<4x1xf32>
    %122 = vector.broadcast %121 : vector<4x1xf32> to vector<4x4xf32>
    %123 = arith.subf %119, %122 : vector<4x4xf32>
    %124 = math.exp %123 : vector<4x4xf32>
    %cst_34 = arith.constant dense<0.000000e+00> : vector<4xf32>
    %125 = vector.multi_reduction <add>, %124, %cst_34 [1] : vector<4x4xf32> to vector<4xf32>
    %126 = vector.shape_cast %125 : vector<4xf32> to vector<4x1xf32>
    %127 = tpu.reciprocal %126 {approx = true} : vector<4x1xf32> -> vector<4x1xf32>
    %128 = vector.broadcast %127 : vector<4x1xf32> to vector<4x4xf32>
    %129 = arith.mulf %124, %128 : vector<4x4xf32>
    %130 = arith.truncf %129 : vector<4x4xf32> to vector<4x4xbf16>
    %cst_35 = arith.constant dense<0.000000e+00> : vector<4x4xf32>
    %131 = tpu.matmul %118, %130, %cst_35 {dimension_numbers = #tpu.dot_dimension_numbers<[1], [1], [0], [0], [0, 0, 1, 0], [], []>} : vector<4x4xbf16>, vector<4x4xbf16>, vector<4x4xf32> -> vector<4x4xf32>
    %132 = arith.truncf %131 : vector<4x4xf32> to vector<4x4xbf16>
    %c20 = arith.constant 20 : index
    %c0_36 = arith.constant 0 : index
    %133 = vector.load %arg8[%c20, %c0_36] : memref<32x4xbf16, #tpu.memory_space<vmem>>, vector<4x4xbf16>
    tpu.vector_store %arg8[%c20, %c0_36], %132 {strides = array<i32>} : memref<32x4xbf16, #tpu.memory_space<vmem>>, vector<4x4xbf16>,
    %134 = vector.extract_strided_slice %7 {offsets = [24, 0], sizes = [4, 4], strides = [1, 1]} : vector<96x4xf32> to vector<4x4xf32>
    %135 = arith.truncf %134 : vector<4x4xf32> to vector<4x4xbf16>
    %136 = vector.extract_strided_slice %7 {offsets = [56, 0], sizes = [4, 4], strides = [1, 1]} : vector<96x4xf32> to vector<4x4xf32>
    %137 = arith.truncf %136 : vector<4x4xf32> to vector<4x4xbf16>
    %138 = vector.extract_strided_slice %7 {offsets = [88, 0], sizes = [4, 4], strides = [1, 1]} : vector<96x4xf32> to vector<4x4xf32>
    %139 = arith.truncf %138 : vector<4x4xf32> to vector<4x4xbf16>
    %cst_37 = arith.constant dense<0.000000e+00> : vector<4x4xf32>
    %140 = tpu.matmul %135, %137, %cst_37 {dimension_numbers = #tpu.dot_dimension_numbers<[0], [0], [1], [1], [0, 1, 1, 1], [], []>} : vector<4x4xbf16>, vector<4x4xbf16>, vector<4x4xf32> -> vector<4x4xf32>
    %cst_38 = arith.constant dense<0xFF800000> : vector<4xf32>
    %141 = vector.multi_reduction <maximumf>, %140, %cst_38 [1] : vector<4x4xf32> to vector<4xf32>
    %142 = vector.shape_cast %141 : vector<4xf32> to vector<4x1xf32>
    %143 = vector.broadcast %142 : vector<4x1xf32> to vector<4x4xf32>
    %144 = arith.subf %140, %143 : vector<4x4xf32>
    %145 = math.exp %144 : vector<4x4xf32>
    %cst_39 = arith.constant dense<0.000000e+00> : vector<4xf32>
    %146 = vector.multi_reduction <add>, %145, %cst_39 [1] : vector<4x4xf32> to vector<4xf32>
    %147 = vector.shape_cast %146 : vector<4xf32> to vector<4x1xf32>
    %148 = tpu.reciprocal %147 {approx = true} : vector<4x1xf32> -> vector<4x1xf32>
    %149 = vector.broadcast %148 : vector<4x1xf32> to vector<4x4xf32>
    %150 = arith.mulf %145, %149 : vector<4x4xf32>
    %151 = arith.truncf %150 : vector<4x4xf32> to vector<4x4xbf16>
    %cst_40 = arith.constant dense<0.000000e+00> : vector<4x4xf32>
    %152 = tpu.matmul %139, %151, %cst_40 {dimension_numbers = #tpu.dot_dimension_numbers<[1], [1], [0], [0], [0, 0, 1, 0], [], []>} : vector<4x4xbf16>, vector<4x4xbf16>, vector<4x4xf32> -> vector<4x4xf32>
    %153 = arith.truncf %152 : vector<4x4xf32> to vector<4x4xbf16>
    %c24 = arith.constant 24 : index
    %c0_41 = arith.constant 0 : index
    %154 = vector.load %arg8[%c24, %c0_41] : memref<32x4xbf16, #tpu.memory_space<vmem>>, vector<4x4xbf16>
    tpu.vector_store %arg8[%c24, %c0_41], %153 {strides = array<i32>} : memref<32x4xbf16, #tpu.memory_space<vmem>>, vector<4x4xbf16>,
    %155 = vector.extract_strided_slice %7 {offsets = [28, 0], sizes = [4, 4], strides = [1, 1]} : vector<96x4xf32> to vector<4x4xf32>
    %156 = arith.truncf %155 : vector<4x4xf32> to vector<4x4xbf16>
    %157 = vector.extract_strided_slice %7 {offsets = [60, 0], sizes = [4, 4], strides = [1, 1]} : vector<96x4xf32> to vector<4x4xf32>
    %158 = arith.truncf %157 : vector<4x4xf32> to vector<4x4xbf16>
    %159 = vector.extract_strided_slice %7 {offsets = [92, 0], sizes = [4, 4], strides = [1, 1]} : vector<96x4xf32> to vector<4x4xf32>
    %160 = arith.truncf %159 : vector<4x4xf32> to vector<4x4xbf16>
    %cst_42 = arith.constant dense<0.000000e+00> : vector<4x4xf32>
    %161 = tpu.matmul %156, %158, %cst_42 {dimension_numbers = #tpu.dot_dimension_numbers<[0], [0], [1], [1], [0, 1, 1, 1], [], []>} : vector<4x4xbf16>, vector<4x4xbf16>, vector<4x4xf32> -> vector<4x4xf32>
    %cst_43 = arith.constant dense<0xFF800000> : vector<4xf32>
    %162 = vector.multi_reduction <maximumf>, %161, %cst_43 [1] : vector<4x4xf32> to vector<4xf32>
    %163 = vector.shape_cast %162 : vector<4xf32> to vector<4x1xf32>
    %164 = vector.broadcast %163 : vector<4x1xf32> to vector<4x4xf32>
    %165 = arith.subf %161, %164 : vector<4x4xf32>
    %166 = math.exp %165 : vector<4x4xf32>
    %cst_44 = arith.constant dense<0.000000e+00> : vector<4xf32>
    %167 = vector.multi_reduction <add>, %166, %cst_44 [1] : vector<4x4xf32> to vector<4xf32>
    %168 = vector.shape_cast %167 : vector<4xf32> to vector<4x1xf32>
    %169 = tpu.reciprocal %168 {approx = true} : vector<4x1xf32> -> vector<4x1xf32>
    %170 = vector.broadcast %169 : vector<4x1xf32> to vector<4x4xf32>
    %171 = arith.mulf %166, %170 : vector<4x4xf32>
    %172 = arith.truncf %171 : vector<4x4xf32> to vector<4x4xbf16>
    %cst_45 = arith.constant dense<0.000000e+00> : vector<4x4xf32>
    %173 = tpu.matmul %160, %172, %cst_45 {dimension_numbers = #tpu.dot_dimension_numbers<[1], [1], [0], [0], [0, 0, 1, 0], [], []>} : vector<4x4xbf16>, vector<4x4xbf16>, vector<4x4xf32> -> vector<4x4xf32>
    %174 = arith.truncf %173 : vector<4x4xf32> to vector<4x4xbf16>
    %c28 = arith.constant 28 : index
    %c0_46 = arith.constant 0 : index
    %175 = vector.load %arg8[%c28, %c0_46] : memref<32x4xbf16, #tpu.memory_space<vmem>>, vector<4x4xbf16>
    tpu.vector_store %arg8[%c28, %c0_46], %174 {strides = array<i32>} : memref<32x4xbf16, #tpu.memory_space<vmem>>, vector<4x4xbf16>,
    %c0_47 = arith.constant 0 : index
    %c0_48 = arith.constant 0 : index
    %176 = vector.load %arg5[%c0_47, %c0_48] : memref<64x32xbf16, #tpu.memory_space<vmem>>, vector<64x32xbf16>
    %c0_49 = arith.constant 0 : index
    %c0_50 = arith.constant 0 : index
    %177 = vector.load %arg8[%c0_49, %c0_50] : memref<32x4xbf16, #tpu.memory_space<vmem>>, vector<32x4xbf16>
    %cst_51 = arith.constant dense<0.000000e+00> : vector<64x4xf32>
    %178 = tpu.matmul %176, %177, %cst_51 {dimension_numbers = #tpu.dot_dimension_numbers<[1], [0], [0], [1], [0, 0, 1, 1], [], []>} : vector<64x32xbf16>, vector<32x4xbf16>, vector<64x4xf32> -> vector<64x4xf32>
    %c0_52 = arith.constant 0 : index
    %c0_53 = arith.constant 0 : index
    %179 = vector.load %arg6[%c0_52, %c0_53] : memref<64x1xf32, #tpu.memory_space<vmem>>, vector<64x1xf32>
    %180 = vector.broadcast %179 : vector<64x1xf32> to vector<64x4xf32>
    %181 = arith.addf %178, %180 : vector<64x4xf32>
    %c0_54 = arith.constant 0 : index
    %c0_55 = arith.constant 0 : index
    %c0_56 = arith.constant 0 : index
    %182 = vector.load %arg7[%c0_54, %c0_55, %c0_56] : memref<1x64x4xf32, #tpu.memory_space<vmem>>, vector<1x64x4xf32>
    %183 = vector.shape_cast %182 : vector<1x64x4xf32> to vector<64x4xf32>
    %184 = vector.shape_cast %181 : vector<64x4xf32> to vector<1x64x4xf32>
    tpu.vector_store %arg7[%c0_54, %c0_55, %c0_56], %184 {strides = array<i32>} : memref<1x64x4xf32, #tpu.memory_space<vmem>>, vector<1x64x4xf32>,
    return
  }
  func.func @transform_0(%arg0: i32, %arg1: i32) -> (i32, i32, i32) {
    %c4_i32 = arith.constant 4 : i32
    %0 = arith.muli %arg0, %c4_i32 : i32
    %1 = arith.addi %0, %arg1 : i32
    %c0_i32 = arith.constant 0 : i32
    %c0_i32_0 = arith.constant 0 : i32
    %c0_i32_1 = arith.constant 0 : i32
    return %1, %c0_i32, %c0_i32_0 : i32, i32, i32
  }
  func.func @transform_1(%arg0: i32, %arg1: i32) -> (i32, i32) {
    %c0_i32 = arith.constant 0 : i32
    %c0_i32_0 = arith.constant 0 : i32
    %c0_i32_1 = arith.constant 0 : i32
    return %c0_i32, %c0_i32_0 : i32, i32
  }
  func.func @transform_2(%arg0: i32, %arg1: i32) -> (i32, i32) {
    %c0_i32 = arith.constant 0 : i32
    %c0_i32_0 = arith.constant 0 : i32
    %c0_i32_1 = arith.constant 0 : i32
    return %c0_i32, %c0_i32_0 : i32, i32
  }
  func.func @transform_3(%arg0: i32, %arg1: i32) -> (i32, i32) {
    %c0_i32 = arith.constant 0 : i32
    %c0_i32_0 = arith.constant 0 : i32
    %c0_i32_1 = arith.constant 0 : i32
    return %c0_i32, %c0_i32_0 : i32, i32
  }
  func.func @transform_4(%arg0: i32, %arg1: i32) -> (i32, i32) {
    %c0_i32 = arith.constant 0 : i32
    %c0_i32_0 = arith.constant 0 : i32
    %c0_i32_1 = arith.constant 0 : i32
    return %c0_i32, %c0_i32_0 : i32, i32
  }
  func.func @transform_5(%arg0: i32, %arg1: i32) -> (i32, i32, i32) {
    %c4_i32 = arith.constant 4 : i32
    %0 = arith.muli %arg0, %c4_i32 : i32
    %1 = arith.addi %0, %arg1 : i32
    %c0_i32 = arith.constant 0 : i32
    %c0_i32_0 = arith.constant 0 : i32
    %c0_i32_1 = arith.constant 0 : i32
    return %1, %c0_i32, %c0_i32_0 : i32, i32, i32
  }
}

</mosaic_0001>

<bundles_post_ra>
// kernel: emha_forward.1
= control target key start
LH: loop header
LB: loop body
LE: loop exit
PB: predicated region body
PF: predicated region fallthrough
CT: control target
= control target key end

     0   :  { %s2157_s18 = smov 0   ;;  %s2159_s19 = smov 0   ;;  %s2478_s0 = inlined_call_operand.vmem [shape: f32[8,64,4], index: 0, kind: input, shape index: {}]   ;;  %s2479_s1 = inlined_call_operand.vmem [shape: bf16[96,64], index: 1, kind: input, shape index: {}]   ;;  %s2480_s2 = inlined_call_operand.vmem [shape: f32[96,1], index: 2, kind: input, shape index: {}]   ;;  %s2481_s3 = inlined_call_operand.vmem [shape: bf16[64,32], index: 3, kind: input, shape index: {}]   ;;  %s2482_s4 = inlined_call_operand.vmem [shape: f32[64,1], index: 4, kind: input, shape index: {}]   ;;  %s2483_s5 = inlined_call_operand.vmem [shape: f32[8,64,4], index: 5, kind: output, shape index: {}]  }
   0x1   :  { %s2161_s20 = smov 0   ;;  %s2163_s21 = smov 0  }
   0x2   :  { %s2165_s22 = smov 0  }
   0x3 LB: > { %s24_s23 = sadd.s32 1, %s2114_s20  ;;  %s27_s24 = sadd.s32 1, %s2118_s21  ;;  %s2122_s22 = sphi %s2165_s22, %s15_s22   ;;  %s2118_s21 = sphi %s2163_s21, %s2487_s21   ;;  %s2114_s20 = sphi %s2161_s20, %s2486_s20   ;;  %s2110_s19 = sphi %s2159_s19, %s2485_s19   ;;  %s2106_s18 = sphi %s2157_s18, %s2484_s18  }
   0x4   : > { %p25_p0 = scmp.ge.s32.totalorder %s24_s23, 4  ;;  %p1774_p1 = scmp.ge.s32.totalorder %s2122_s22, 1 }
   0x5   : > { %p211_p2 = scmp.lt.s32.totalorder %s2122_s22, 9 }
   0x6   : > { %s2489_s23 = smov (%p25_p0, %s24_s23), 0  ;;  %s2491_s24 = smov (!%p25_p0, %s27_s24), %s2118_s21 }
   0x7   : > { %p212_p3 = pnand %p1774_p1, %p211_p2  ;;  %p29_p4 = scmp.ge.s32.totalorder %s2491_s24, 2 }
   0x8   : > { %s1775_s25 = sshll.u32 (!%p212_p3), %s2110_s19, 2  ;;  %v2042_v0 = vld [vmem:[%s2479_s1] sm:$0xff] (!%p212_p3)   ;;  %vm388_vm0 = vcmask (!%p212_p3), 523264   ;;  %v2124_v1 = vmov (!%p212_p3), 0   ;;  %v2043_v16 = vld [vmem:[%s2479_s1 + $0x8] sm:$0xff] (!%p212_p3)   ;;  %v2044_v17 = vld [vmem:[%s2479_s1 + $0x10] sm:$0xff] (!%p212_p3)  }
   0x9   : > { %s2493_s24 = smov (%p29_p4, %s2491_s24), 0  ;;  %215 = sbr.rel (%p212_p3) target bundleno = 2489 (0x9b9), region = 40 }
   0xa   : > { %s244_s28 = sadd.s32 (!%p212_p3), %s2106_s18, %s1775_s25  ;;  %1877 = vmatprep.mubr.msk.bf16.mxu0 (!%p212_p3), %vm388_vm0, %v2042_v0  ;;  %2040 = vset.pattern.permute.xlu0 (!%p212_p3), %v2124_v1  ;;  %v286_v2 = vld [vmem:[%s2480_s2] sm:$0xff] (!%p212_p3)  ;;  %v2045_v18 = vld [vmem:[%s2479_s1 + $0x18] sm:$0xff] (!%p212_p3)   ;;  %v2125_v19 = vmov (!%p212_p3), 0.0   ;;  %v2047_v21 = vld [vmem:[%s2479_s1 + $0x28] sm:$0xff] (!%p212_p3)   ;;  %vm2126_vm1 = vmmov (!%p212_p3), 0   ;;  %vm511_vm2 = vcmask (!%p212_p3), 1041408  }
   0xb   : > { %p245_p5 = scmp.lt.s32.totalorder (!%p212_p3), %s244_s28, 7  ;;  %300 = vperm.xlu0 (!%p212_p3), %2040, %v286_v2   ;;  %v290_v3 = vld [vmem:[%s2480_s2 + $0x20] sm:$0xff] (!%p212_p3)  ;;  %1895 = vmatprep.subr.bf16.mxu1 (!%p212_p3), %v2125_v19  ;;  %vm507_vm3 = vcmask (!%p212_p3), 31744   ;;  %vm555_vm4 = vcmask (!%p212_p3), 27648   ;;  %v288_v49 = vld [vmem:[%s2480_s2 + $0x10] sm:$0xff] (!%p212_p3)  ;;  %v289_v50 = vld [vmem:[%s2480_s2 + $0x18] sm:$0xff] (!%p212_p3) }
   0xc   : > { %v2046_v20 = vld [vmem:[%s2479_s1 + $0x20] sm:$0xff] (!%p212_p3)   ;;  %1897 = vmatprep.mubr.msk.bf16.mxu1 (!%p212_p3), %vm2126_vm1, %v2125_v19  ;;  %v291_v51 = vld [vmem:[%s2480_s2 + $0x28] sm:$0xff] (!%p212_p3)  ;;  %v292_v52 = vld [vmem:[%s2480_s2 + $0x30] sm:$0xff] (!%p212_p3)  ;;  %vm615_vm5 = vcmask (!%p212_p3), 25600   ;;  %vm748_vm6 = vcmask (!%p212_p3), 27650   ;;  %vm1607_vm7 = vcmask (!%p212_p3), 261120  }
   0xd   : > { %v294_v47 = vld [vmem:[%s2480_s2 + $0x40] sm:$0xff] (!%p212_p3)  ;;  %v293_v53 = vld [vmem:[%s2480_s2 + $0x38] sm:$0xff] (!%p212_p3)  ;;  %vm877_vm8 = vcmask (!%p212_p3), 29700   ;;  %vm1010_vm9 = vcmask (!%p212_p3), 31750  }
   0xf   : > { %320 = vperm.xlu0 (!%p212_p3), %2040, %v290_v3  }
  0x10   : > { %s2495_s28 = smov (!%p245_p5, %s244_s28), 7 }
  0x11   : > { %s1819_s6 = sshll.u32 %s2495_s28, 6 }
  0x12   : > { %s249_s11 = scalar_lea.vmem %s2478_s0, %s1819_s6  ;;  %s258_s14 = scalar_lea.vmem %s2483_s5, %s1819_s6 }
  0x13   : > { %v262_v4 = vld [vmem:[%s249_s11] sm:$0xff]  ;;  %v263_v5 = vld [vmem:[%s249_s11 + $0x8] sm:$0xff]  ;;  %v264_v6 = vld [vmem:[%s249_s11 + $0x10] sm:$0xff] }
  0x14   : > { %v270_v7 = vpack.c.bf16 %v263_v5, %v262_v4  ;;  %v265_v8 = vld [vmem:[%s249_s11 + $0x18] sm:$0xff]  ;;  %v266_v10 = vld [vmem:[%s249_s11 + $0x20] sm:$0xff]  ;;  %v267_v11 = vld [vmem:[%s249_s11 + $0x28] sm:$0xff] }
  0x15   : > { %v271_v9 = vpack.c.bf16 %v265_v8, %v264_v6  ;;  %v272_v12 = vpack.c.bf16 %v267_v11, %v266_v10  ;;  %v268_v13 = vld [vmem:[%s249_s11 + $0x30] sm:$0xff]  ;;  %v269_v14 = vld [vmem:[%s249_s11 + $0x38] sm:$0xff] }
  0x16   : > { %1869 = vmatprep.subr.bf16.mxu0 %v270_v7  ;;  %v273_v15 = vpack.c.bf16 %v269_v14, %v268_v13 }
  0x17   : > { %1870 = vmatpush3.bf16.msra.mxu0 %v270_v7 }
  0x18   : > { %1871 = vmatprep.subr.bf16.mxu0 %v271_v9 }
  0x1b   : > { %1872 = vmatpush3.bf16.msra.mxu0 %v271_v9 }
  0x1c   : > { %1873 = vmatprep.subr.bf16.mxu0 %v272_v12 }
  0x1f   : > { %1874 = vmatpush3.bf16.msra.mxu0 %v272_v12 }
  0x20   : > { %1875 = vmatprep.subr.bf16.mxu0 %v273_v15 }
  0x23   : > { %1876 = vmatpush3.bf16.msra.mxu0 %v273_v15 }
  0x24   : > { %1889 = vmatprep.subr.bf16.mxu0 %v2125_v19 }
  0x26   : > { %1878 = vmatmul.mubr.msk.bf16.vlgmr.msra.gmra.mrb[0].mxu0 %vm388_vm0, %v2043_v16  ;;  %v287_v16 = vld [vmem:[%s2480_s2 + $0x8] sm:$0xff] }
  0x27   : > { %1881 = vmatprep.mubr.msk.bf16.mxu0 %vm388_vm0, %v2044_v17 }
  0x2e   : > { %1882 = vmatmul.mubr.msk.bf16.gmra.mrb[4].mxu0 %vm388_vm0, %v2045_v18 }
  0x2f   : > { %1885 = vmatprep.mubr.msk.bf16.mxu0 %vm388_vm0, %v2046_v20 }
  0x36   : > { %1886 = vmatmul.mubr.msk.bf16.gmra.mrb[8].mxu0 %vm388_vm0, %v2047_v21 }
  0x37   : > { %1891 = vmatprep.mubr.msk.bf16.mxu0 %vm2126_vm1, %v2125_v19 }
  0x8a   : > { %v301_v23 = vpop.permute.xlu0 %300 }
  0x8e   : > { %v321_v30 = vpop.permute.xlu0 %320 }
  0xf9   : > { %v2231_v22 = vpop.f32.mrb[0].mxu0 }
  0xfa   : > { %v441_v24 = vpop.f32.mrb[1].mxu0 }
  0xfb   : > { %v442_v25 = vadd.f32 %v441_v24, %v301_v23  ;;  %v2233_v26 = vpop.f32.mrb[2].mxu0 }
  0xfc   : > { %v2235_v27 = vpop.f32.mrb[3].mxu0 }
  0xfd   : > { %v488_v28 = vpack.c.bf16 %v442_v25, %v442_v25 }
  0xff   : > { %491 = vxpose.xlu1.c.b16.start.end [1/1] (short) (narrow) %v488_v28, 16  ;;  %v618_v48 = vrot.slane %v488_v28, 2 }
 0x101   : > { %v2237_v29 = vpop.f32.mrb[4].mxu0 }
 0x102   : > { %v457_v31 = vpop.f32.mrb[5].mxu0 }
 0x103   : > { %v458_v32 = vadd.f32 %v457_v31, %v321_v30  ;;  %v2239_v33 = vpop.f32.mrb[6].mxu0  ;;  %2041 = vset.pattern.permute.xlu1 %v2124_v1 }
 0x104   : > { %v2241_v34 = vpop.f32.mrb[7].mxu0 }
 0x105   : > { %v489_v35 = vpack.c.bf16 %v458_v32, %v458_v32 }
 0x107   : > { %v513_v36 = vsel %vm511_vm2, %v489_v35, 0  ;;  %v637_v2 = vrot.slane %v489_v35, 2 }
 0x108   : > { %1890 = vmatpush3.bf16.msra.mxu0 %v513_v36 }
 0x109   : > { %1919 = vmatprep.subr.bf16.mxu0 %v2125_v19  ;;  %v2245_v37 = vpop.f32.mrb[8].mxu0  ;;  %v642_v4 = vsel %vm511_vm2, %v637_v2, 0 }
 0x10a   : > { %v473_v38 = vpop.f32.mrb[9].mxu0 }
 0x10b   : > { %v2247_v39 = vpop.f32.mrb[10].mxu0 }
 0x10c   : > { %v2249_v40 = vpop.f32.mrb[11].mxu0 }
 0x165   : > { %v499_v41 = vpop.trf.xlu1 }
 0x166   : > { %1892 = vmatmul.mubr.msk.bf16.vlgmr.msra.gmra.mrb[12].mxu0 %vm507_vm3, %v499_v41 }
 0x167   : > { %1921 = vmatprep.mubr.msk.bf16.mxu0 %vm2126_vm1, %v2125_v19 }
 0x239   : > { %v549_v42 = vpop.f32.mrb[12].mxu0 }
 0x23a   : > { %v1893_v43 = vpop.f32.mrb[13].mxu0  ;;  %v556_v44 = vsel %vm555_vm4, %v549_v42, -inf }
 0x23b   : > { %557 = vmax.xlane.f32.xlu1 %v556_v44  ;;  %v552_v45 = vpop.f32.mrb[14].mxu0 }
 0x23c   : > { %v1894_v46 = vpop.f32.mrb[15].mxu0 }
 0x24c   : > { %340 = vperm.xlu1 %2041, %v294_v47  }
 0x26f   : > { %620 = vxpose.xlu1.c.b16.start.end [1/1] (short) (narrow) %v618_v48, 16 }
 0x273   : > { %310 = vperm.xlu1 %2041, %v288_v49  }
 0x277   : > { %315 = vperm.xlu1 %2041, %v289_v50  }
 0x27b   : > { %325 = vperm.xlu1 %2041, %v291_v51  }
 0x27f   : > { %330 = vperm.xlu1 %2041, %v292_v52  }
 0x283   : > { %335 = vperm.xlu1 %2041, %v293_v53  }
 0x2c8   : > { %v558_v54 = vpop.xlane.xlu1 %557 }
 0x2c9   : > { %v559_v55 = vsub.f32 %v549_v42, %v558_v54 }
 0x2cb   : > { %v560_v56 = vmul.f32 1.442695, %v559_v55 }
 0x2cc   : > { %v341_v63 = vpop.permute.xlu1 %340 }
 0x2cd   : > { %2052 = vpow2.f32 %v560_v56  ;;  %v474_v1 = vadd.f32 %v473_v38, %v341_v63 }
 0x2cf   : > { %v2276_v3 = vpack.c.bf16 %v474_v1, %v474_v1 }
 0x2d1   : > { %v697_v50 = vrot.slane %v2276_v3, 2 }
 0x2d5   : > { %v628_v5 = vpop.trf.xlu1 }
 0x2d7   : > { %v2053_v57 = vpop.eup %2052 }
 0x2d8   : > { %v562_v58 = vsel %vm555_vm4, %v2053_v57, 0.0 }
 0x2d9   : > { %563 = vadd.xlane.f32.xlu0 %v562_v58 }
 0x2f2   : > { %v311_v21 = vpop.permute.xlu1 %310 }
 0x2f3   : > { %v450_v25 = vadd.f32 %v2231_v22, %v311_v21 }
 0x2f5   : > { %v1012_v31 = vpack.c.bf16 %v450_v25, %v450_v25 }
 0x2f6   : > { %v316_v32 = vpop.permute.xlu1 %315 }
 0x2f7   : > { %v1138_v36 = vrot.slane %v1012_v31, 2  ;;  %v453_v38 = vadd.f32 %v2233_v26, %v316_v32 }
 0x2f9   : > { %v1269_v41 = vpack.c.bf16 %v453_v38, %v453_v38 }
 0x2fa   : > { %v326_v45 = vpop.permute.xlu1 %325 }
 0x2fb   : > { %v1398_v42 = vrot.slane %v1269_v41, 2  ;;  %v461_v47 = vadd.f32 %v2241_v34, %v326_v45 }
 0x2fd   : > { %v751_v49 = vpack.c.bf16 %v461_v47, %v461_v47 }
 0x2fe   : > { %v331_v26 = vpop.permute.xlu1 %330 }
 0x2ff   : > { %v773_v51 = vsel %vm511_vm2, %v751_v49, 0  ;;  %v899_v34 = vrot.slane %v751_v49, 2  ;;  %v466_v54 = vadd.f32 %v2237_v29, %v331_v26 }
 0x301   : > { %v904_v55 = vsel %vm511_vm2, %v899_v34, 0  ;;  %v1013_v56 = vpack.c.bf16 %v466_v54, %v466_v54 }
 0x302   : > { %v336_v52 = vpop.permute.xlu1 %335 }
 0x303   : > { %v1035_v58 = vsel %vm511_vm2, %v1013_v56, 0  ;;  %v1157_v29 = vrot.slane %v1013_v56, 2 }
 0x366   : > { %v564_v59 = vpop.xlane.xlu0 %563 }
 0x367   : > { %2054 = vrcp.f32 %v564_v59 }
 0x371   : > { %v2055_v60 = vpop.eup %2054 }
 0x372   : > { %v566_v61 = vmul.f32 %v2055_v60, %v2053_v57  ;;  %v469_v60 = vadd.f32 %v2239_v33, %v336_v52 }
 0x374   : > { %v567_v62 = vpack.c.bf16 %v566_v61, %v566_v61  ;;  %v1162_v61 = vsel %vm511_vm2, %v1157_v29, 0 }
 0x376   : > { %v572_v0 = vsel %vm507_vm3, %v567_v62, 0  ;;  %v1270_v62 = vpack.c.bf16 %v469_v60, %v469_v60 }
 0x377   : > { %1896 = vmatpush3.bf16.xpose.msra.mxu1 %v572_v0 }
 0x378   : > { %1901 = vmatprep.subr.bf16.mxu1 %v2125_v19  ;;  %v1292_v0 = vsel %vm511_vm2, %v1270_v62, 0  ;;  %v1417_v33 = vrot.slane %v1270_v62, 2 }
 0x37a   : > { %v1422_v2 = vsel %vm511_vm2, %v1417_v33, 0 }
 0x37e   : > { %1898 = vmatmul.mubr.msk.bf16.vlgmr.msra.gmra.mrb[0].mxu1 %vm507_vm3, %v2276_v3 }
 0x37f   : > { %1902 = vmatpush3.bf16.msra.mxu1 %v642_v4  ;;  %1903 = vmatprep.mubr.msk.bf16.mxu1 %vm2126_vm1, %v2125_v19 }
 0x380   : > { %1907 = vmatprep.subr.bf16.mxu1 %v2125_v19 }
 0x386   : > { %1904 = vmatmul.mubr.msk.bf16.vlgmr.msra.gmra.mrb[4].mxu1 %vm507_vm3, %v628_v5 }
 0x387   : > { %1909 = vmatprep.mubr.msk.bf16.mxu1 %vm2126_vm1, %v2125_v19 }
 0x451   : > { %v608_v6 = vpop.f32.mrb[0].mxu1 }
 0x452   : > { %v614_v7 = vpack.c.bf16 %v608_v6, %v608_v6  ;;  %v1899_v8 = vpop.f32.mrb[1].mxu1 }
 0x453   : > { %v611_v9 = vpop.f32.mrb[2].mxu1 }
 0x454   : > { %616 = vst.msk [vmem:[#allocation2] sm:$0x3] %vm615_vm5, %v614_v7  ;;  %v1900_v10 = vpop.f32.mrb[3].mxu1 }
 0x459   : > { %v678_v11 = vpop.f32.mrb[4].mxu1 }
 0x45a   : > { %v1905_v12 = vpop.f32.mrb[5].mxu1  ;;  %v684_v13 = vsel %vm555_vm4, %v678_v11, -inf }
 0x45b   : > { %685 = vmax.xlane.f32.xlu0 %v684_v13  ;;  %v681_v14 = vpop.f32.mrb[6].mxu1 }
 0x45c   : > { %v1906_v15 = vpop.f32.mrb[7].mxu1 }
 0x471   : > { %305 = vperm.xlu0 %2040, %v287_v16  }
 0x4e8   : > { %v686_v17 = vpop.xlane.xlu0 %685 }
 0x4e9   : > { %v687_v18 = vsub.f32 %v678_v11, %v686_v17 }
 0x4eb   : > { %v688_v20 = vmul.f32 1.442695, %v687_v18 }
 0x4ed   : > { %2056 = vpow2.f32 %v688_v20 }
 0x4f0   : > { %v306_v23 = vpop.permute.xlu0 %305 }
 0x4f1   : > { %v445_v24 = vadd.f32 %v2235_v27, %v306_v23 }
 0x4f3   : > { %v750_v28 = vpack.c.bf16 %v445_v24, %v445_v24 }
 0x4f5   : > { %753 = vxpose.xlu1.c.b16.start.end [1/1] (short) (narrow) %v750_v28, 16  ;;  %v880_v27 = vrot.slane %v750_v28, 2 }
 0x4f7   : > { %v2057_v30 = vpop.eup %2056 }
 0x4f8   : > { %v690_v35 = vsel %vm555_vm4, %v2057_v30, 0.0 }
 0x4f9   : > { %691 = vadd.xlane.f32.xlu0 %v690_v35  ;;  %1015 = vxpose.xlu1.c.b16.start.end [1/1] (short) (narrow) %v1012_v31, 16 }
 0x4fd   : > { %1140 = vxpose.xlu1.c.b16.start.end [1/1] (short) (narrow) %v1138_v36, 16 }
 0x501   : > { %1272 = vxpose.xlu1.c.b16.start.end [1/1] (short) (narrow) %v1269_v41, 16 }
 0x505   : > { %1400 = vxpose.xlu1.c.b16.start.end [1/1] (short) (narrow) %v1398_v42, 16 }
 0x526   : > { %882 = vxpose.xlu0.c.b16.start.end [1/1] (short) (narrow) %v880_v27, 16 }
 0x55b   : > { %v761_v53 = vpop.trf.xlu1 }
 0x55f   : > { %v1023_v59 = vpop.trf.xlu1 }
 0x563   : > { %v1148_v63 = vpop.trf.xlu1 }
 0x567   : > { %v1280_v1 = vpop.trf.xlu1 }
 0x56b   : > { %v1408_v3 = vpop.trf.xlu1 }
 0x586   : > { %v692_v22 = vpop.xlane.xlu0 %691 }
 0x587   : > { %2058 = vrcp.f32 %v692_v22 }
 0x58c   : > { %v890_v57 = vpop.trf.xlu0 }
 0x591   : > { %v2059_v43 = vpop.eup %2058 }
 0x592   : > { %v694_v44 = vmul.f32 %v2059_v43, %v2057_v30 }
 0x594   : > { %v695_v46 = vpack.c.bf16 %v694_v44, %v694_v44 }
 0x596   : > { %v702_v48 = vsel %vm507_vm3, %v695_v46, 0 }
 0x597   : > { %1908 = vmatpush3.bf16.xpose.msra.mxu1 %v702_v48 }
 0x598   : > { %1913 = vmatprep.subr.bf16.mxu1 %v2125_v19 }
 0x59e   : > { %1910 = vmatmul.mubr.msk.bf16.vlgmr.msra.gmra.mrb[8].mxu1 %vm507_vm3, %v697_v50 }
 0x59f   : > { %1914 = vmatpush3.bf16.msra.mxu1 %v773_v51  ;;  %1915 = vmatprep.mubr.msk.bf16.mxu1 %vm2126_vm1, %v2125_v19 }
 0x5a0   : > { %1925 = vmatprep.subr.bf16.mxu1 %v2125_v19 }
 0x5a6   : > { %1916 = vmatmul.mubr.msk.bf16.vlgmr.msra.gmra.mrb[12].mxu1 %vm507_vm3, %v761_v53 }
 0x5a7   : > { %1926 = vmatpush3.bf16.msra.mxu1 %v904_v55  ;;  %1927 = vmatprep.mubr.msk.bf16.mxu1 %vm2126_vm1, %v2125_v19 }
 0x5a8   : > { %1937 = vmatprep.subr.bf16.mxu1 %v2125_v19 }
 0x5ae   : > { %1928 = vmatmul.mubr.msk.bf16.vlgmr.msra.gmra.mrb[16].mxu1 %vm507_vm3, %v890_v57 }
 0x5af   : > { %1938 = vmatpush3.bf16.msra.mxu1 %v1035_v58  ;;  %1939 = vmatprep.mubr.msk.bf16.mxu1 %vm2126_vm1, %v2125_v19 }
 0x5b0   : > { %1949 = vmatprep.subr.bf16.mxu1 %v2125_v19 }
 0x5b6   : > { %1940 = vmatmul.mubr.msk.bf16.vlgmr.msra.gmra.mrb[20].mxu1 %vm507_vm3, %v1023_v59 }
 0x5b7   : > { %1950 = vmatpush3.bf16.msra.mxu1 %v1162_v61  ;;  %1951 = vmatprep.mubr.msk.bf16.mxu1 %vm2126_vm1, %v2125_v19 }
 0x5b8   : > { %1961 = vmatprep.subr.bf16.mxu1 %v2125_v19 }
 0x5be   : > { %1952 = vmatmul.mubr.msk.bf16.vlgmr.msra.gmra.mrb[24].mxu1 %vm507_vm3, %v1148_v63 }
 0x5bf   : > { %1962 = vmatpush3.bf16.msra.mxu1 %v1292_v0  ;;  %1963 = vmatprep.mubr.msk.bf16.mxu1 %vm2126_vm1, %v2125_v19 }
 0x5c0   : > { %1973 = vmatprep.subr.bf16.mxu1 %v2125_v19 }
 0x5c6   : > { %1964 = vmatmul.mubr.msk.bf16.vlgmr.msra.gmra.mrb[28].mxu1 %vm507_vm3, %v1280_v1 }
 0x5c7   : > { %1974 = vmatpush3.bf16.msra.mxu1 %v1422_v2  ;;  %1975 = vmatprep.mubr.msk.bf16.mxu1 %vm2126_vm1, %v2125_v19 }
 0x5ce   : > { %1976 = vmatmul.mubr.msk.bf16.vlgmr.msra.gmra.mrb[32].mxu1 %vm507_vm3, %v1408_v3 }
 0x671   : > { %v738_v4 = vpop.f32.mrb[8].mxu1 }
 0x672   : > { %v744_v5 = vpack.c.bf16 %v738_v4, %v738_v4  ;;  %v1911_v6 = vpop.f32.mrb[9].mxu1 }
 0x673   : > { %v741_v7 = vpop.f32.mrb[10].mxu1 }
 0x674   : > { %v746_v8 = vrot.slane %v744_v5, 6  ;;  %v1912_v9 = vpop.f32.mrb[11].mxu1  ;;  %v295_v7 = vld [vmem:[%s2480_s2 + $0x48] sm:$0xff] }
 0x675   : > { %v297_v9 = vld [vmem:[%s2480_s2 + $0x58] sm:$0xff] }
 0x676   : > { %749 = vst.msk [vmem:[#allocation2] sm:$0xc] %vm748_vm6, %v746_v8 }
 0x679   : > { %v809_v10 = vpop.f32.mrb[12].mxu1 }
 0x67a   : > { %v1917_v11 = vpop.f32.mrb[13].mxu1  ;;  %v815_v12 = vsel %vm555_vm4, %v809_v10, -inf }
 0x67b   : > { %816 = vmax.xlane.f32.xlu1 %v815_v12  ;;  %v812_v13 = vpop.f32.mrb[14].mxu1  ;;  %v1539_v11 = vld [vmem:[%s2482_s4] sm:$0xff] }
 0x67c   : > { %v1918_v14 = vpop.f32.mrb[15].mxu1  ;;  %v1540_v13 = vld [vmem:[%s2482_s4 + $0x8] sm:$0xff] }
 0x67d   : > { %v1541_v14 = vld [vmem:[%s2482_s4 + $0x10] sm:$0xff] }
 0x681   : > { %v940_v15 = vpop.f32.mrb[16].mxu1 }
 0x682   : > { %v1929_v16 = vpop.f32.mrb[17].mxu1  ;;  %v946_v17 = vsel %vm555_vm4, %v940_v15, -inf }
 0x683   : > { %947 = vmax.xlane.f32.xlu0 %v946_v17  ;;  %v943_v18 = vpop.f32.mrb[18].mxu1  ;;  %v1545_v16 = vld [vmem:[%s2482_s4 + $0x30] sm:$0xff] }
 0x684   : > { %v1930_v20 = vpop.f32.mrb[19].mxu1  ;;  %v296_v17 = vld [vmem:[%s2480_s2 + $0x50] sm:$0xff]  ;;  %v1542_v18 = vld [vmem:[%s2482_s4 + $0x18] sm:$0xff] }
 0x685   : > { %v1544_v20 = vld [vmem:[%s2482_s4 + $0x28] sm:$0xff] }
 0x689   : > { %v1071_v21 = vpop.f32.mrb[20].mxu1 }
 0x68a   : > { %v1941_v23 = vpop.f32.mrb[21].mxu1  ;;  %v1077_v24 = vsel %vm555_vm4, %v1071_v21, -inf }
 0x68b   : > { %1078 = vmax.xlane.f32.xlu1 %v1077_v24  ;;  %v1074_v25 = vpop.f32.mrb[22].mxu1 }
 0x68c   : > { %v1942_v28 = vpop.f32.mrb[23].mxu1 }
 0x691   : > { %v1198_v30 = vpop.f32.mrb[24].mxu1 }
 0x692   : > { %v1953_v31 = vpop.f32.mrb[25].mxu1  ;;  %v1204_v32 = vsel %vm555_vm4, %v1198_v30, -inf }
 0x693   : > { %1205 = vmax.xlane.f32.xlu0 %v1204_v32  ;;  %v1201_v35 = vpop.f32.mrb[26].mxu1 }
 0x694   : > { %v1954_v36 = vpop.f32.mrb[27].mxu1 }
 0x699   : > { %v1328_v38 = vpop.f32.mrb[28].mxu1 }
 0x69a   : > { %v1965_v41 = vpop.f32.mrb[29].mxu1  ;;  %v1334_v42 = vsel %vm555_vm4, %v1328_v38, -inf }
 0x69b   : > { %1335 = vmax.xlane.f32.xlu1 %v1334_v42  ;;  %v1331_v27 = vpop.f32.mrb[30].mxu1 }
 0x69c   : > { %v1966_v22 = vpop.f32.mrb[31].mxu1 }
 0x6a1   : > { %v1458_v43 = vpop.f32.mrb[32].mxu1 }
 0x6a2   : > { %v1977_v44 = vpop.f32.mrb[33].mxu1  ;;  %v1464_v45 = vsel %vm555_vm4, %v1458_v43, -inf }
 0x6a3   : > { %1465 = vmax.xlane.f32.xlu0 %v1464_v45  ;;  %v1461_v46 = vpop.f32.mrb[34].mxu1 }
 0x6a4   : > { %v1978_v47 = vpop.f32.mrb[35].mxu1 }
 0x708   : > { %v817_v48 = vpop.xlane.xlu1 %816 }
 0x709   : > { %v818_v26 = vsub.f32 %v809_v10, %v817_v48 }
 0x70b   : > { %v819_v49 = vmul.f32 1.442695, %v818_v26 }
 0x70d   : > { %2060 = vpow2.f32 %v819_v49 }
 0x710   : > { %v948_v50 = vpop.xlane.xlu0 %947 }
 0x711   : > { %v949_v51 = vsub.f32 %v940_v15, %v948_v50  ;;  %v1543_v15 = vld [vmem:[%s2482_s4 + $0x20] sm:$0xff] }
 0x713   : > { %v950_v52 = vmul.f32 1.442695, %v949_v51 }
 0x715   : > { %2062 = vpow2.f32 %v950_v52 }
 0x717   : > { %v2061_v34 = vpop.eup %2060 }
 0x718   : > { %v1079_v53 = vpop.xlane.xlu1 %1078  ;;  %v821_v54 = vsel %vm555_vm4, %v2061_v34, 0.0 }
 0x719   : > { %v1080_v55 = vsub.f32 %v1071_v21, %v1079_v53  ;;  %822 = vadd.xlane.f32.xlu1 %v821_v54  ;;  %v1546_v21 = vld [vmem:[%s2482_s4 + $0x38] sm:$0xff] }
 0x71b   : > { %v1081_v56 = vmul.f32 1.442695, %v1080_v55 }
 0x71d   : > { %2064 = vpow2.f32 %v1081_v56 }
 0x71f   : > { %v2340_v57 = vpop.eup %2062 }
 0x720   : > { %v1206_v58 = vpop.xlane.xlu0 %1205  ;;  %v952_v29 = vsel %vm555_vm4, %v2340_v57, 0.0 }
 0x721   : > { %v1207_v59 = vsub.f32 %v1198_v30, %v1206_v58  ;;  %953 = vadd.xlane.f32.xlu0 %v952_v29 }
 0x723   : > { %v1208_v60 = vmul.f32 1.442695, %v1207_v59 }
 0x725   : > { %2066 = vpow2.f32 %v1208_v60 }
 0x727   : > { %v2344_v61 = vpop.eup %2064 }
 0x728   : > { %v1336_v62 = vpop.xlane.xlu1 %1335  ;;  %v1083_v63 = vsel %vm555_vm4, %v2344_v61, 0.0 }
 0x729   : > { %v1337_v0 = vsub.f32 %v1328_v38, %v1336_v62  ;;  %1084 = vadd.xlane.f32.xlu1 %v1083_v63 }
 0x72b   : > { %v1338_v33 = vmul.f32 1.442695, %v1337_v0 }
 0x72d   : > { %2068 = vpow2.f32 %v1338_v33 }
 0x72f   : > { %v2348_v1 = vpop.eup %2066 }
 0x730   : > { %v1466_v2 = vpop.xlane.xlu0 %1465  ;;  %v1210_v3 = vsel %vm555_vm4, %v2348_v1, 0.0 }
 0x731   : > { %v1467_v4 = vsub.f32 %v1458_v43, %v1466_v2  ;;  %1211 = vadd.xlane.f32.xlu0 %v1210_v3 }
 0x733   : > { %v1468_v5 = vmul.f32 1.442695, %v1467_v4 }
 0x735   : > { %2070 = vpow2.f32 %v1468_v5 }
 0x737   : > { %v2352_v6 = vpop.eup %2068 }
 0x738   : > { %v1340_v8 = vsel %vm555_vm4, %v2352_v6, 0.0 }
 0x739   : > { %1341 = vadd.xlane.f32.xlu0 %v1340_v8 }
 0x73a   : > { %345 = vperm.xlu1 %2041, %v295_v7  }
 0x73e   : > { %355 = vperm.xlu1 %2041, %v297_v9  }
 0x73f   : > { %v2362_v10 = vpop.eup %2070 }
 0x740   : > { %v1470_v12 = vsel %vm555_vm4, %v2362_v10, 0.0 }
 0x741   : > { %1471 = vadd.xlane.f32.xlu0 %v1470_v12 }
 0x742   : > { %1549 = vperm.xlu1 %2041, %v1539_v11  }
 0x746   : > { %1554 = vperm.xlu1 %2041, %v1540_v13  }
 0x74a   : > { %1559 = vperm.xlu1 %2041, %v1541_v14  }
 0x74e   : > { %1569 = vperm.xlu1 %2041, %v1543_v15  }
 0x752   : > { %1579 = vperm.xlu1 %2041, %v1545_v16  }
 0x757   : > { %350 = vperm.xlu0 %2040, %v296_v17  }
 0x75b   : > { %1564 = vperm.xlu0 %2040, %v1542_v18  }
 0x75f   : > { %1574 = vperm.xlu0 %2040, %v1544_v20  }
 0x763   : > { %1584 = vperm.xlu0 %2040, %v1546_v21  }
 0x7a6   : > { %v823_v23 = vpop.xlane.xlu1 %822 }
 0x7a7   : > { %2072 = vrcp.f32 %v823_v23 }
 0x7ae   : > { %v954_v24 = vpop.xlane.xlu0 %953 }
 0x7af   : > { %2074 = vrcp.f32 %v954_v24 }
 0x7b1   : > { %v2073_v25 = vpop.eup %2072 }
 0x7b2   : > { %v825_v28 = vmul.f32 %v2073_v25, %v2061_v34 }
 0x7b4   : > { %v826_v30 = vpack.c.bf16 %v825_v28, %v825_v28 }
 0x7b6   : > { %v1085_v31 = vpop.xlane.xlu1 %1084  ;;  %v831_v32 = vsel %vm507_vm3, %v826_v30, 0 }
 0x7b7   : > { %2076 = vrcp.f32 %v1085_v31  ;;  %1920 = vmatpush3.bf16.xpose.msra.mxu0 %v831_v32 }
 0x7b8   : > { %1931 = vmatprep.subr.bf16.mxu0 %v2125_v19 }
 0x7b9   : > { %v2075_v35 = vpop.eup %2074 }
 0x7ba   : > { %v346_v36 = vpop.permute.xlu1 %345  ;;  %v956_v38 = vmul.f32 %v2075_v35, %v2340_v57 }
 0x7bb   : > { %v477_v41 = vadd.f32 %v2249_v40, %v346_v36 }
 0x7bc   : > { %v957_v42 = vpack.c.bf16 %v956_v38, %v956_v38 }
 0x7bd   : > { %v752_v27 = vpack.c.bf16 %v477_v41, %v477_v41 }
 0x7be   : > { %v964_v22 = vsel %vm507_vm3, %v957_v42, 0  ;;  %v1212_v45 = vpop.xlane.xlu0 %1211  ;;  %v356_v59 = vpop.permute.xlu1 %355 }
 0x7bf   : > { %1922 = vmatmul.mubr.msk.bf16.vlgmr.msra.gmra.mrb[16].mxu0 %vm507_vm3, %v752_v27  ;;  %v959_v47 = vrot.slane %v752_v27, 2  ;;  %2078 = vrcp.f32 %v1212_v45  ;;  %v2049_v45 = vld [vmem:[%s2481_s3 + $0x8] sm:$0xff]  }
 0x7c0   : > { %1932 = vmatpush3.bf16.xpose.msra.mxu0 %v964_v22  ;;  %1933 = vmatprep.mubr.msk.bf16.mxu0 %vm2126_vm1, %v2125_v19 }
 0x7c1   : > { %v2077_v43 = vpop.eup %2076  ;;  %1943 = vmatprep.subr.bf16.mxu0 %v2125_v19 }
 0x7c2   : > { %v1087_v44 = vmul.f32 %v2077_v43, %v2344_v61  ;;  %v485_v61 = vadd.f32 %v2247_v39, %v356_v59 }
 0x7c4   : > { %v1088_v46 = vpack.c.bf16 %v1087_v44, %v1087_v44  ;;  %v1271_v63 = vpack.c.bf16 %v485_v61, %v485_v61 }
 0x7c6   : > { %v1093_v40 = vsel %vm507_vm3, %v1088_v46, 0  ;;  %v1342_v48 = vpop.xlane.xlu0 %1341  ;;  %v1477_v33 = vrot.slane %v1271_v63, 2  ;;  %v2050_v46 = vld [vmem:[%s2481_s3 + $0x10] sm:$0xff]  }
 0x7c7   : > { %1934 = vmatmul.mubr.msk.bf16.vlgmr.msra.gmra.mrb[20].mxu0 %vm507_vm3, %v959_v47  ;;  %2080 = vrcp.f32 %v1342_v48  ;;  %v2051_v47 = vld [vmem:[%s2481_s3 + $0x18] sm:$0xff]  }
 0x7c8   : > { %1944 = vmatpush3.bf16.xpose.msra.mxu0 %v1093_v40  ;;  %1945 = vmatprep.mubr.msk.bf16.mxu0 %vm2126_vm1, %v2125_v19  ;;  %v1550_v40 = vpop.permute.xlu1 %1549 }
 0x7c9   : > { %1955 = vmatprep.subr.bf16.mxu0 %v2125_v19  ;;  %v2079_v26 = vpop.eup %2078 }
 0x7ca   : > { %v1214_v50 = vmul.f32 %v2079_v26, %v2348_v1  ;;  %v2048_v1 = vld [vmem:[%s2481_s3] sm:$0xff]  }
 0x7cb   : > { %1989 = vmatprep.mubr.msk.bf16.mxu1 %vm1607_vm7, %v2048_v1 }
 0x7cc   : > { %v1215_v34 = vpack.c.bf16 %v1214_v50, %v1214_v50  ;;  %v1555_v48 = vpop.permute.xlu1 %1554 }
 0x7ce   : > { %v1472_v49 = vpop.xlane.xlu0 %1471  ;;  %v1222_v55 = vsel %vm507_vm3, %v1215_v34, 0 }
 0x7cf   : > { %2082 = vrcp.f32 %v1472_v49 }
 0x7d0   : > { %v1560_v26 = vpop.permute.xlu1 %1559 }
 0x7d1   : > { %v2081_v53 = vpop.eup %2080 }
 0x7d2   : > { %v1344_v56 = vmul.f32 %v2081_v53, %v2352_v6 }
 0x7d4   : > { %v1345_v57 = vpack.c.bf16 %v1344_v56, %v1344_v56  ;;  %v1570_v34 = vpop.permute.xlu1 %1569 }
 0x7d6   : > { %v351_v51 = vpop.permute.xlu0 %350 }
 0x7d7   : > { %v482_v52 = vadd.f32 %v2245_v37, %v351_v51  ;;  %v1350_v37 = vsel %vm507_vm3, %v1345_v57, 0 }
 0x7d9   : > { %v1014_v54 = vpack.c.bf16 %v482_v52, %v482_v52  ;;  %v2083_v58 = vpop.eup %2082 }
 0x7da   : > { %v1474_v60 = vmul.f32 %v2083_v58, %v2362_v10  ;;  %v1565_v49 = vpop.permute.xlu0 %1564 }
 0x7db   : > { %1946 = vmatmul.mubr.msk.bf16.vlgmr.msra.gmra.mrb[24].mxu0 %vm507_vm3, %v1014_v54  ;;  %v1217_v29 = vrot.slane %v1014_v54, 2 }
 0x7dc   : > { %1956 = vmatpush3.bf16.xpose.msra.mxu0 %v1222_v55  ;;  %1957 = vmatprep.mubr.msk.bf16.mxu0 %vm2126_vm1, %v2125_v19  ;;  %v1475_v62 = vpack.c.bf16 %v1474_v60, %v1474_v60 }
 0x7dd   : > { %1967 = vmatprep.subr.bf16.mxu0 %v2125_v19 }
 0x7de   : > { %v1482_v0 = vsel %vm507_vm3, %v1475_v62, 0  ;;  %v1575_v57 = vpop.permute.xlu0 %1574 }
 0x7e2   : > { %v1585_v61 = vpop.permute.xlu0 %1584 }
 0x7e3   : > { %1958 = vmatmul.mubr.msk.bf16.vlgmr.msra.gmra.mrb[28].mxu0 %vm507_vm3, %v1217_v29  ;;  %v1580_v29 = vpop.permute.xlu1 %1579 }
 0x7e4   : > { %1968 = vmatpush3.bf16.xpose.msra.mxu0 %v1350_v37  ;;  %1969 = vmatprep.mubr.msk.bf16.mxu0 %vm2126_vm1, %v2125_v19 }
 0x7e5   : > { %1979 = vmatprep.subr.bf16.mxu0 %v2125_v19 }
 0x7eb   : > { %1970 = vmatmul.mubr.msk.bf16.vlgmr.msra.gmra.mrb[32].mxu0 %vm507_vm3, %v1271_v63 }
 0x7ec   : > { %1980 = vmatpush3.bf16.xpose.msra.mxu0 %v1482_v0  ;;  %1981 = vmatprep.mubr.msk.bf16.mxu0 %vm2126_vm1, %v2125_v19 }
 0x7f3   : > { %1982 = vmatmul.mubr.msk.bf16.vlgmr.msra.gmra.mrb[36].mxu0 %vm507_vm3, %v1477_v33 }
 0x892   : > { %v867_v39 = vpop.f32.mrb[16].mxu0 }
 0x893   : > { %v873_v2 = vpack.c.bf16 %v867_v39, %v867_v39  ;;  %v1923_v3 = vpop.f32.mrb[17].mxu0 }
 0x894   : > { %v870_v4 = vpop.f32.mrb[18].mxu0 }
 0x895   : > { %v875_v5 = vrot.slane %v873_v2, 4  ;;  %v1924_v6 = vpop.f32.mrb[19].mxu0 }
 0x897   : > { %878 = vst.msk [vmem:[#allocation2] sm:$0x30] %vm877_vm8, %v875_v5 }
 0x89a   : > { %v1000_v19 = vpop.f32.mrb[20].mxu0 }
 0x89b   : > { %v1006_v7 = vpack.c.bf16 %v1000_v19, %v1000_v19  ;;  %v1935_v8 = vpop.f32.mrb[21].mxu0 }
 0x89c   : > { %v1003_v9 = vpop.f32.mrb[22].mxu0 }
 0x89d   : > { %v1008_v10 = vrot.slane %v1006_v7, 2  ;;  %v1936_v11 = vpop.f32.mrb[23].mxu0 }
 0x89f   : > { %1011 = vst.msk [vmem:[#allocation2] sm:$0xc0] %vm1010_vm9, %v1008_v10 }
 0x8a6   : > { %v1537_v12 = vld [vmem:[#allocation2] sm:$0xff] }
 0x8a7   : > { %1985 = vmatprep.subr.bf16.mxu1 %v1537_v12 }
 0x8a8   : > { %1986 = vmatpush3.bf16.msra.mxu1 %v1537_v12 }
 0x8ae   : > { %v1129_v13 = vpop.f32.mrb[24].mxu0 }
 0x8af   : > { %v1135_v14 = vpack.c.bf16 %v1129_v13, %v1129_v13  ;;  %v1947_v15 = vpop.f32.mrb[25].mxu0 }
 0x8b0   : > { %v1132_v16 = vpop.f32.mrb[26].mxu0 }
 0x8b1   : > { %1136 = vst.msk [vmem:[#allocation2 + $0x8] sm:$0x3] %vm615_vm5, %v1135_v14  ;;  %v1948_v17 = vpop.f32.mrb[27].mxu0 }
 0x8b6   : > { %v1258_v18 = vpop.f32.mrb[28].mxu0 }
 0x8b7   : > { %v1264_v20 = vpack.c.bf16 %v1258_v18, %v1258_v18  ;;  %v1959_v21 = vpop.f32.mrb[29].mxu0 }
 0x8b8   : > { %v1261_v23 = vpop.f32.mrb[30].mxu0 }
 0x8b9   : > { %v1266_v24 = vrot.slane %v1264_v20, 6  ;;  %v1960_v25 = vpop.f32.mrb[31].mxu0 }
 0x8bb   : > { %1268 = vst.msk [vmem:[#allocation2 + $0x8] sm:$0xc] %vm748_vm6, %v1266_v24 }
 0x8be   : > { %v1386_v28 = vpop.f32.mrb[32].mxu0 }
 0x8bf   : > { %v1392_v30 = vpack.c.bf16 %v1386_v28, %v1386_v28  ;;  %v1971_v31 = vpop.f32.mrb[33].mxu0 }
 0x8c0   : > { %v1389_v32 = vpop.f32.mrb[34].mxu0 }
 0x8c1   : > { %v1394_v35 = vrot.slane %v1392_v30, 4  ;;  %v1972_v36 = vpop.f32.mrb[35].mxu0 }
 0x8c3   : > { %1396 = vst.msk [vmem:[#allocation2 + $0x8] sm:$0x30] %vm877_vm8, %v1394_v35 }
 0x8c6   : > { %v1518_v38 = vpop.f32.mrb[36].mxu0 }
 0x8c7   : > { %v1524_v41 = vpack.c.bf16 %v1518_v38, %v1518_v38  ;;  %v1983_v42 = vpop.f32.mrb[37].mxu0 }
 0x8c8   : > { %v1521_v27 = vpop.f32.mrb[38].mxu0 }
 0x8c9   : > { %v1526_v22 = vrot.slane %v1524_v41, 2  ;;  %v1984_v43 = vpop.f32.mrb[39].mxu0 }
 0x8cb   : > { %1528 = vst.msk [vmem:[#allocation2 + $0x8] sm:$0xc0] %vm1010_vm9, %v1526_v22 }
 0x8d2   : > { %v1538_v44 = vld [vmem:[#allocation2 + $0x8] sm:$0xff] }
 0x8d3   : > { %1987 = vmatprep.subr.bf16.mxu1 %v1538_v44 }
 0x8d4   : > { %1988 = vmatpush3.bf16.msra.mxu1 %v1538_v44 }
 0x8d7   : > { %1990 = vmatmul.mubr.msk.bf16.vlgmr.msra.gmra.mrb[36].mxu1 %vm1607_vm7, %v2049_v45 }
 0x8d8   : > { %1993 = vmatprep.mubr.msk.bf16.mxu1 %vm1607_vm7, %v2050_v46 }
 0x8df   : > { %1994 = vmatmul.mubr.msk.bf16.gmra.mrb[40].mxu1 %vm1607_vm7, %v2051_v47 }
 0x9aa   : > { %v1991_v50 = vpop.f32.mrb[36].mxu1 }
 0x9ab   : > { %v1663_v51 = vadd.f32 %v1991_v50, %v1560_v26  ;;  %v1654_v52 = vpop.f32.mrb[37].mxu1 }
 0x9ac   : > { %v1655_v53 = vadd.f32 %v1654_v52, %v1550_v40  ;;  %v1992_v54 = vpop.f32.mrb[38].mxu1 }
 0x9ad   : > { %1687 = vst.msk [vmem:[%s258_s14 + $0x10] sm:$0xff] %vm507_vm3, %v1663_v51  ;;  %v1666_v55 = vadd.f32 %v1992_v54, %v1565_v49  ;;  %v1657_v56 = vpop.f32.mrb[39].mxu1 }
 0x9ae   : > { %1685 = vst.msk [vmem:[%s258_s14] sm:$0xff] %vm507_vm3, %v1655_v53  ;;  %v1658_v58 = vadd.f32 %v1657_v56, %v1555_v48 }
 0x9af   : > { %1688 = vst.msk [vmem:[%s258_s14 + $0x18] sm:$0xff] %vm507_vm3, %v1666_v55 }
 0x9b0   : > { %1686 = vst.msk [vmem:[%s258_s14 + $0x8] sm:$0xff] %vm507_vm3, %v1658_v58 }
 0x9b2   : > { %v1995_v59 = vpop.f32.mrb[40].mxu1 }
 0x9b3   : > { %v1679_v37 = vadd.f32 %v1995_v59, %v1580_v29  ;;  %v1670_v60 = vpop.f32.mrb[41].mxu1 }
 0x9b4   : > { %v1671_v62 = vadd.f32 %v1670_v60, %v1570_v34  ;;  %v1996_v63 = vpop.f32.mrb[42].mxu1 }
 0x9b5   : > { %1691 = vst.msk [vmem:[%s258_s14 + $0x30] sm:$0xff] %vm507_vm3, %v1679_v37  ;;  %v1682_v0 = vadd.f32 %v1996_v63, %v1585_v61  ;;  %v1673_v33 = vpop.f32.mrb[43].mxu1 }
 0x9b6   : > { %1689 = vst.msk [vmem:[%s258_s14 + $0x20] sm:$0xff] %vm507_vm3, %v1671_v62  ;;  %v1674_v1 = vadd.f32 %v1673_v33, %v1575_v57 }
 0x9b7   : > { %1692 = vst.msk [vmem:[%s258_s14 + $0x38] sm:$0xff] %vm507_vm3, %v1682_v0 }
 0x9b8   : > { %1690 = vst.msk [vmem:[%s258_s14 + $0x28] sm:$0xff] %vm507_vm3, %v1674_v1 }
 0x9b9 PF: > { %s15_s22 = sadd.s32 1, %s2122_s22   ;;  %s2484_s18 = smov %s2114_s20 }
 0x9ba   : > { %p12_p6 = scmp.ge.s32.totalorder %s15_s22, 10   ;;  %s2485_s19 = smov %s2118_s21 }
 0x9bb   : > { %s2486_s20 = smov %s2489_s23  ;;  %s2487_s21 = smov %s2493_s24 }
 0x9bc   :  { %14 = sbr.rel (!%p12_p6) target bundleno = 3 (0x3), region = 70 }

</bundles_post_ra>
